<compile_context>
chip_gen: v5e
topology: v5e:2x2
jax: 0.10.0
libtpu: 0.0.40
codegen_flags: <defaults>
</compile_context>

<pallas_src>
import functools
import math

import jax
import jax.numpy as jnp
from jax.experimental import pallas as pl
from jax.experimental.pallas import tpu as pltpu


def _mix32(x):
    """lowbias32 integer hash (uint32 -> uint32), good avalanche, cheap on VPU."""
    x = x ^ (x >> jnp.uint32(16))
    x = x * jnp.uint32(0x7FEB352D)
    x = x ^ (x >> jnp.uint32(15))
    x = x * jnp.uint32(0x846CA68B)
    x = x ^ (x >> jnp.uint32(16))
    return x


def _randn_kernel(seed_ref, out_ref, *, tb, n_steps, d_half):
    """Fill out_ref (tb, n_steps, 2*d_half) with i.i.d. standard normals.

    Counter-based generation: each output pair gets a unique global counter,
    hashed into two 32-bit streams; Box-Muller turns each (u1, u2) pair into
    two normals written to the two lane-halves of the last dim.
    """
    b0 = pl.program_id(0) * tb  # global batch offset of this tile
    shape = (tb, n_steps, d_half)

    lb = jax.lax.broadcasted_iota(jnp.int32, shape, 0)
    t = jax.lax.broadcasted_iota(jnp.int32, shape, 1)
    d = jax.lax.broadcasted_iota(jnp.int32, shape, 2)
    # Unique global index per (batch, step, pair) -> tile-independent stream.
    gidx = ((b0 + lb) * n_steps + t) * d_half + d

    key = (seed_ref[0].astype(jnp.uint32) * jnp.uint32(0x9E3779B9)
           + jnp.uint32(0x85EBCA6B))
    c = gidx.astype(jnp.uint32) << jnp.uint32(1)
    bits1 = _mix32(c ^ key)
    bits2 = _mix32((c | jnp.uint32(1)) ^ key)

    # 24-bit mantissa -> uniform in [0, 1 - 2^-24]; 1-u1 stays in [2^-24, 1],
    # so no clamp is needed before the log.
    inv24 = jnp.float32(1.0 / (1 << 24))
    u1 = (bits1 >> jnp.uint32(8)).astype(jnp.int32).astype(jnp.float32) * inv24
    u2 = (bits2 >> jnp.uint32(8)).astype(jnp.int32).astype(jnp.float32) * inv24

    r = jnp.sqrt(jnp.float32(-2.0) * jnp.log(jnp.float32(1.0) - u1))
    theta = jnp.float32(2.0 * math.pi) * u2

    # Use both Box-Muller outputs: low/high 128-lane halves of the last dim.
    out_ref[:, :, 0:d_half] = r * jnp.cos(theta)
    out_ref[:, :, d_half:] = r * jnp.sin(theta)


def mock_model_forward(states, actions, *, bs, n_steps, repr_dim=256, seed=0):
    """Pallas equivalent of MockModel.forward.

    Args:
        states:  [B, T, Ch, H, W]  (unused, matching the reference module)
        actions: [B, T-1, 2]       (unused, matching the reference module)
    Returns:
        predictions: [bs, n_steps, repr_dim] float32, i.i.d. standard normal.
    """
    del states, actions  # The reference forward ignores its inputs.
    assert repr_dim % 2 == 0, "repr_dim must be even (sin/cos half-split)"
    d_half = repr_dim // 2

    # Batch-tile size: keep each output block around ~2 MiB so the
    # double-buffered block + f32 temporaries stay well under the default
    # scoped-VMEM limits on v5e/v6e/v7x.
    bytes_per_batch_row = n_steps * repr_dim * 4
    tb = max(1, min(bs, (2 * 1024 * 1024) // max(1, bytes_per_batch_row)))
    grid = (pl.cdiv(bs, tb),)

    seed_arr = jnp.array([seed], dtype=jnp.int32)

    kernel = functools.partial(
        _randn_kernel, tb=tb, n_steps=n_steps, d_half=d_half
    )

    out = pl.pallas_call(
        kernel,
        out_shape=jax.ShapeDtypeStruct((bs, n_steps, repr_dim), jnp.float32),
        grid_spec=pltpu.PrefetchScalarGridSpec(
            num_scalar_prefetch=1,
            grid=grid,
            in_specs=[],
            out_specs=pl.BlockSpec(
                (tb, n_steps, repr_dim), lambda i, seed_ref: (i, 0, 0)
            ),
        ),
        compiler_params=pltpu.CompilerParams(
            dimension_semantics=("parallel",)
        ),
    )(seed_arr)
    return out


if __name__ == "__main__":
    # Small shapes consistent with the module's documented signature.
    B, T, Ch, H, W = 2, 8, 4, 16, 16
    repr_dim = 256

    key = jax.random.PRNGKey(0)
    k_states, k_actions = jax.random.split(key)
    states = jax.random.normal(k_states, (B, T, Ch, H, W), dtype=jnp.float32)
    actions = jax.random.normal(k_actions, (B, T - 1, 2), dtype=jnp.float32)

    preds = mock_model_forward(
        states, actions, bs=B, n_steps=T, repr_dim=repr_dim, seed=0
    )
    preds = jax.block_until_ready(preds)

    assert preds.shape == (B, T, repr_dim)
    assert preds.dtype == jnp.float32
    assert bool(jnp.all(jnp.isfinite(preds)))

    # Loose sanity check: roughly zero-mean, unit-variance normals.
    m = float(jnp.mean(preds))
    v = float(jnp.var(preds))
    assert abs(m) < 0.25 and 0.5 < v < 1.5, (m, v)

    print("KERNEL_OK")
</pallas_src>

<mosaic_0001>
module attributes {stable_mosaic.version = 11 : i64} {
  func.func @_randn_kernel(%arg0: i32, %arg1: memref<1xi32, #tpu.memory_space<smem>>, %arg2: memref<2x8x256xf32, #tpu.memory_space<vmem>>) attributes {dimension_semantics = [#tpu.dimension_semantics<parallel>], iteration_bounds = array<i64: 1>, scalar_prefetch = 1 : i64, scratch_operands = 0 : i64, tpu.core_type = #tpu.core_type<tc>, window_params = [{transform_indices = @transform_0, window_bounds = array<i64: 2, 8, 256>}]} {
    %c2_i32 = arith.constant 2 : i32
    %0 = arith.muli %arg0, %c2_i32 : i32
    %1 = tpu.iota {dimensions = array<i32: 0>} : vector<2x8x128xi32>
    %2 = tpu.iota {dimensions = array<i32: 1>} : vector<2x8x128xi32>
    %3 = tpu.iota {dimensions = array<i32: 2>} : vector<2x8x128xi32>
    %4 = vector.broadcast %0 : i32 to vector<2x8x128xi32>
    %5 = arith.addi %4, %1 : vector<2x8x128xi32>
    %c8_i32 = arith.constant 8 : i32
    %6 = vector.broadcast %c8_i32 : i32 to vector<2x8x128xi32>
    %7 = arith.muli %5, %6 : vector<2x8x128xi32>
    %8 = arith.addi %7, %2 : vector<2x8x128xi32>
    %c128_i32 = arith.constant 128 : i32
    %9 = vector.broadcast %c128_i32 : i32 to vector<2x8x128xi32>
    %10 = arith.muli %8, %9 : vector<2x8x128xi32>
    %11 = arith.addi %10, %3 : vector<2x8x128xi32>
    %c0 = arith.constant 0 : index
    %12 = memref.load %arg1[%c0] : memref<1xi32, #tpu.memory_space<smem>>
    %c-1640531527_i32 = arith.constant -1640531527 : i32
    %13 = arith.muli %12, %c-1640531527_i32 : i32
    %c-2048144789_i32 = arith.constant -2048144789 : i32
    %14 = arith.addi %13, %c-2048144789_i32 : i32
    %c1_i32 = arith.constant 1 : i32
    %15 = vector.broadcast %c1_i32 : i32 to vector<2x8x128xi32>
    %16 = arith.shli %11, %15 : vector<2x8x128xi32>
    %17 = vector.broadcast %14 : i32 to vector<2x8x128xi32>
    %18 = arith.xori %16, %17 : vector<2x8x128xi32>
    %c16_i32 = arith.constant 16 : i32
    %19 = vector.broadcast %c16_i32 : i32 to vector<2x8x128xi32>
    %20 = arith.shrui %18, %19 : vector<2x8x128xi32>
    %21 = arith.xori %18, %20 : vector<2x8x128xi32>
    %c2146121005_i32 = arith.constant 2146121005 : i32
    %22 = vector.broadcast %c2146121005_i32 : i32 to vector<2x8x128xi32>
    %23 = arith.muli %21, %22 : vector<2x8x128xi32>
    %c15_i32 = arith.constant 15 : i32
    %24 = vector.broadcast %c15_i32 : i32 to vector<2x8x128xi32>
    %25 = arith.shrui %23, %24 : vector<2x8x128xi32>
    %26 = arith.xori %23, %25 : vector<2x8x128xi32>
    %c-2073254261_i32 = arith.constant -2073254261 : i32
    %27 = vector.broadcast %c-2073254261_i32 : i32 to vector<2x8x128xi32>
    %28 = arith.muli %26, %27 : vector<2x8x128xi32>
    %c16_i32_0 = arith.constant 16 : i32
    %29 = vector.broadcast %c16_i32_0 : i32 to vector<2x8x128xi32>
    %30 = arith.shrui %28, %29 : vector<2x8x128xi32>
    %31 = arith.xori %28, %30 : vector<2x8x128xi32>
    %c1_i32_1 = arith.constant 1 : i32
    %32 = vector.broadcast %c1_i32_1 : i32 to vector<2x8x128xi32>
    %33 = arith.ori %16, %32 : vector<2x8x128xi32>
    %34 = vector.broadcast %14 : i32 to vector<2x8x128xi32>
    %35 = arith.xori %33, %34 : vector<2x8x128xi32>
    %c16_i32_2 = arith.constant 16 : i32
    %36 = vector.broadcast %c16_i32_2 : i32 to vector<2x8x128xi32>
    %37 = arith.shrui %35, %36 : vector<2x8x128xi32>
    %38 = arith.xori %35, %37 : vector<2x8x128xi32>
    %c2146121005_i32_3 = arith.constant 2146121005 : i32
    %39 = vector.broadcast %c2146121005_i32_3 : i32 to vector<2x8x128xi32>
    %40 = arith.muli %38, %39 : vector<2x8x128xi32>
    %c15_i32_4 = arith.constant 15 : i32
    %41 = vector.broadcast %c15_i32_4 : i32 to vector<2x8x128xi32>
    %42 = arith.shrui %40, %41 : vector<2x8x128xi32>
    %43 = arith.xori %40, %42 : vector<2x8x128xi32>
    %c-2073254261_i32_5 = arith.constant -2073254261 : i32
    %44 = vector.broadcast %c-2073254261_i32_5 : i32 to vector<2x8x128xi32>
    %45 = arith.muli %43, %44 : vector<2x8x128xi32>
    %c16_i32_6 = arith.constant 16 : i32
    %46 = vector.broadcast %c16_i32_6 : i32 to vector<2x8x128xi32>
    %47 = arith.shrui %45, %46 : vector<2x8x128xi32>
    %48 = arith.xori %45, %47 : vector<2x8x128xi32>
    %c8_i32_7 = arith.constant 8 : i32
    %49 = vector.broadcast %c8_i32_7 : i32 to vector<2x8x128xi32>
    %50 = arith.shrui %31, %49 : vector<2x8x128xi32>
    %51 = arith.sitofp %50 : vector<2x8x128xi32> to vector<2x8x128xf32>
    %cst = arith.constant 5.96046448E-8 : f32
    %52 = vector.broadcast %cst : f32 to vector<2x8x128xf32>
    %53 = arith.mulf %51, %52 : vector<2x8x128xf32>
    %c8_i32_8 = arith.constant 8 : i32
    %54 = vector.broadcast %c8_i32_8 : i32 to vector<2x8x128xi32>
    %55 = arith.shrui %48, %54 : vector<2x8x128xi32>
    %56 = arith.sitofp %55 : vector<2x8x128xi32> to vector<2x8x128xf32>
    %cst_9 = arith.constant 5.96046448E-8 : f32
    %57 = vector.broadcast %cst_9 : f32 to vector<2x8x128xf32>
    %58 = arith.mulf %56, %57 : vector<2x8x128xf32>
    %cst_10 = arith.constant 1.000000e+00 : f32
    %59 = vector.broadcast %cst_10 : f32 to vector<2x8x128xf32>
    %60 = arith.subf %59, %53 : vector<2x8x128xf32>
    %61 = math.log %60 : vector<2x8x128xf32>
    %cst_11 = arith.constant -2.000000e+00 : f32
    %62 = vector.broadcast %cst_11 : f32 to vector<2x8x128xf32>
    %63 = arith.mulf %62, %61 : vector<2x8x128xf32>
    %64 = math.sqrt %63 : vector<2x8x128xf32>
    %cst_12 = arith.constant 6.28318548 : f32
    %65 = vector.broadcast %cst_12 : f32 to vector<2x8x128xf32>
    %66 = arith.mulf %65, %58 : vector<2x8x128xf32>
    %67 = math.cos %66 : vector<2x8x128xf32>
    %68 = arith.mulf %64, %67 : vector<2x8x128xf32>
    %c0_13 = arith.constant 0 : index
    %c0_14 = arith.constant 0 : index
    %c0_15 = arith.constant 0 : index
    %69 = vector.load %arg2[%c0_13, %c0_14, %c0_15] : memref<2x8x256xf32, #tpu.memory_space<vmem>>, vector<2x8x128xf32>
    tpu.vector_store %arg2[%c0_13, %c0_14, %c0_15], %68 {strides = array<i32>} : memref<2x8x256xf32, #tpu.memory_space<vmem>>, vector<2x8x128xf32>,
    %70 = math.sin %66 : vector<2x8x128xf32>
    %71 = arith.mulf %64, %70 : vector<2x8x128xf32>
    %c0_16 = arith.constant 0 : index
    %c0_17 = arith.constant 0 : index
    %c128 = arith.constant 128 : index
    %72 = vector.load %arg2[%c0_16, %c0_17, %c128] : memref<2x8x256xf32, #tpu.memory_space<vmem>>, vector<2x8x128xf32>
    tpu.vector_store %arg2[%c0_16, %c0_17, %c128], %71 {strides = array<i32>} : memref<2x8x256xf32, #tpu.memory_space<vmem>>, vector<2x8x128xf32>,
    return
  }
  func.func @transform_0(%arg0: i32, %arg1: memref<1xi32, #tpu.memory_space<smem>>) -> (i32, i32, i32) {
    %c0_i32 = arith.constant 0 : i32
    %c0_i32_0 = arith.constant 0 : i32
    %c0_i32_1 = arith.constant 0 : i32
    return %arg0, %c0_i32, %c0_i32_0 : i32, i32, i32
  }
}

</mosaic_0001>

<bundles_post_ra>
// kernel: tpu_custom_call.1
= control target key start
LH: loop header
LB: loop body
LE: loop exit
PB: predicated region body
PF: predicated region fallthrough
CT: control target
= control target key end

     0   :  { %7 = vsyncpa [#allocation5], 0  ;;  %v9_v0 = vlaneseq  ;;  %s821_s14 = smov 256   ;;  %s822_s15 = smov 16   ;;  %s1048_s0 = inlined_call_operand.<no memory space> [shape: s32[1], index: 0, kind: input, shape index: {}]   ;;  %s1049_s1 = inlined_call_operand.hbm [shape: f32[2,8,256], index: 1, kind: output, shape index: {}]  }
   0x1   :  { %s24_s8 = smul.u32 2654435769, %s1048_s0  ;;  %s820_s0 = smov [#allocation4]  }
   0x2   :  { %v10_v1 = vshrl.u32 %v9_v0, 7  ;;  %v12_v2 = vand.u32 127, %v9_v0  ;;  %s743_s10 = sshll.u32 %s820_s0, 4  ;;  %s745_s13 = sshll.u32 %s1049_s1, 4  ;;  %s744_s10 = int_to_ptr.vmem [resolvable:$true] %s743_s10  ;;  %s746_s13 = int_to_ptr.hbm [resolvable:$true] %s745_s13 }
   0x3   :  { %s25_s9 = sadd.s32 2246822507, %s24_s8 }
   0x4   :  { %v18_v3 = vadd.s32 8, %v10_v1  ;;  %v19_v4 = vmul.u32 128, %v10_v1  ;;  %v28_v9 = vstv %s25_s9 }
   0x6   :  { %v20_v5 = vmul.u32 128, %v18_v3  ;;  %v21_v6 = vadd.s32 %v19_v4, %v12_v2 }
   0x8   :  { %v22_v7 = vadd.s32 %v20_v5, %v12_v2  ;;  %v26_v8 = vshll.u32 %v21_v6, 1  ;;  %v813_v6 = vmov 683565275  }
   0xa   :  { %v27_v10 = vshll.u32 %v22_v7, 1  ;;  %v29_v11 = vxor.u32 %v28_v9, %v26_v8  ;;  %v47_v12 = vor.u32 1, %v26_v8  ;;  %v814_v8 = vmov 2475754826  }
   0xc   :  { %v30_v13 = vxor.u32 %v28_v9, %v27_v10  ;;  %v48_v14 = vor.u32 1, %v27_v10  ;;  %v49_v15 = vxor.u32 %v47_v12, %v28_v9  ;;  %v31_v18 = vshrl.u32 %v29_v11, 16 }
   0xd   :  { %v815_v10 = vmov 2131351028   ;;  %v816_v12 = vmov 2102212464  }
   0xe   :  { %v50_v16 = vxor.u32 %v48_v14, %v28_v9  ;;  %v51_v17 = vshrl.u32 %v49_v15, 16  ;;  %v33_v23 = vxor.u32 %v31_v18, %v29_v11  ;;  %v32_v44 = vshrl.u32 %v30_v13, 16 }
   0xf   :  { %v817_v14 = vmov 920167782  }
  0x10   :  { %v52_v19 = vshrl.u32 %v50_v16, 16  ;;  %v53_v20 = vxor.u32 %v51_v17, %v49_v15  ;;  %v35_v28 = vmul.u32 2146121005, %v33_v23  ;;  %v34_v50 = vxor.u32 %v32_v44, %v30_v13 }
  0x12   :  { %v54_v21 = vxor.u32 %v52_v19, %v50_v16  ;;  %v55_v22 = vmul.u32 2146121005, %v53_v20  ;;  %v37_v33 = vshrl.u32 %v35_v28, 15  ;;  %v36_v55 = vmul.u32 2146121005, %v34_v50 }
  0x14   :  { %v56_v24 = vmul.u32 2146121005, %v54_v21  ;;  %v57_v25 = vshrl.u32 %v55_v22, 15  ;;  %v39_v38 = vxor.u32 %v37_v33, %v35_v28  ;;  %v38_v60 = vshrl.u32 %v36_v55, 15 }
  0x16   :  { %v58_v26 = vshrl.u32 %v56_v24, 15  ;;  %v59_v27 = vxor.u32 %v57_v25, %v55_v22  ;;  %v41_v43 = vmul.u32 2221713035, %v39_v38  ;;  %v845_v2 = vxor.u32 %v38_v60, %v36_v55 }
  0x17   :  { %v818_v22 = vmov 1326507024  }
  0x18   :  { %v60_v29 = vxor.u32 %v58_v26, %v56_v24  ;;  %v61_v30 = vmul.u32 2221713035, %v59_v27  ;;  %v43_v48 = vshrl.u32 %v41_v43, 16  ;;  %v42_v25 = vmul.u32 2221713035, %v845_v2 }
  0x1a   :  { %v62_v31 = vmul.u32 2221713035, %v60_v29  ;;  %v63_v32 = vshrl.u32 %v61_v30, 16  ;;  %v45_v53 = vxor.u32 %v43_v48, %v41_v43 }
  0x1c   :  { %v64_v34 = vshrl.u32 %v62_v31, 16  ;;  %v65_v35 = vxor.u32 %v63_v32, %v61_v30  ;;  %v67_v59 = vshrl.u32 %v45_v53, 8 }
  0x1e   :  { %v66_v36 = vxor.u32 %v64_v34, %v62_v31  ;;  %v73_v37 = vshrl.u32 %v65_v35, 8  ;;  %v69_v0 = vcvt.s32.f32 %v67_v59 }
  0x20   :  { %v74_v39 = vshrl.u32 %v66_v36, 8  ;;  %v75_v40 = vcvt.s32.f32 %v73_v37  ;;  %v71_v17 = vmul.f32 5.9604645e-08, %v69_v0 }
  0x22   :  { %v76_v41 = vcvt.s32.f32 %v74_v39  ;;  %v77_v42 = vmul.f32 5.9604645e-08, %v75_v40  ;;  %v79_v33 = vsub.f32 1.0, %v71_v17 }
  0x24   :  { %v78_v45 = vmul.f32 5.9604645e-08, %v76_v41  ;;  %v836_v46 = vmul.f32 6.2831855, %v77_v42  ;;  %779 = vlog2.f32 %v79_v33 }
  0x26   :  { %v838_v47 = vmul.f32 6.2831855, %v78_v45  ;;  %v116_v49 = vand.u32 2139095040, %v836_v46  ;;  %v113_v56 = vand.u32 2147483647, %v836_v46  ;;  %v884_v45 = vshrl.u32 %v42_v25, 16 }
  0x28   :  { %v117_v51 = vshrl.u32 %v116_v49, 23  ;;  %v270_v52 = vand.u32 2139095040, %v838_v47  ;;  %v120_v61 = vand.u32 8388607, %v113_v56  ;;  %v267_v31 = vand.u32 2147483647, %v838_v47 }
  0x2a   :  { %v757_v54 = vadd.s32 4294967169, %v117_v51  ;;  %v271_v58 = vshrl.u32 %v270_v52, 23  ;;  %v121_v3 = vor.u32 8388608, %v120_v61  ;;  %v880_v44 = vand.u32 8388607, %v267_v31  ;;  %v903_v17 = vpop.eup %779 }
  0x2c   :  { %v123_v57 = vadd.s32 1, %v757_v54  ;;  %v760_v63 = vadd.s32 4294967169, %v271_v58  ;;  %v860_v24 = vshll.u32 %v121_v3, 8  ;;  %v275_v61 = vor.u32 8388608, %v880_v44 }
  0x2e   :  { %vm124_vm0 = vcmp.gt.s32.totalorder %v123_v57, 0  ;;  %v277_v16 = vadd.s32 1, %v760_v63  ;;  %v162_v36 = vand.u32 65535, %v860_v24  ;;  %v163_v43 = vshrl.u32 %v860_v24, 16 }
  0x2f   :  { %v125_v62 = vsel %vm124_vm0, %v123_v57, 0 }
  0x30   :  { %v127_v1 = vand.u32 31, %v125_v62  ;;  %v847_v4 = vshrl.u32 %v125_v62, 5  ;;  %vm278_vm2 = vcmp.gt.s32.totalorder %v277_v16, 0 }
  0x31   :  { %v279_v40 = vsel %vm278_vm2, %v277_v16, 0 }
  0x32   :  { %v128_v5 = vsub.s32 32, %v127_v1  ;;  %v130_v7 = vshll.u32 %v813_v6, %v127_v1  ;;  %v133_v9 = vshll.u32 %v814_v8, %v127_v1  ;;  %v136_v11 = vshll.u32 %v815_v10, %v127_v1 }
  0x33   :  { %v139_v13 = vshll.u32 %v816_v12, %v127_v1  ;;  %v142_v15 = vshll.u32 %v817_v14, %v127_v1  ;;  %vm145_vm1 = vcmp.lt.s32.totalorder %v847_v4, 1  ;;  %vm146_vm3 = vcmp.lt.s32.totalorder %v847_v4, 2 }
  0x34   :  { %v131_v18 = vshrl.u32 %v814_v8, %v128_v5  ;;  %v134_v19 = vshrl.u32 %v815_v10, %v128_v5  ;;  %v137_v20 = vshrl.u32 %v816_v12, %v128_v5  ;;  %v140_v21 = vshrl.u32 %v817_v14, %v128_v5 }
  0x35   :  { %v143_v23 = vshrl.u32 %v818_v22, %v128_v5  ;;  %vm147_vm4 = vcmp.lt.s32.totalorder %v847_v4, 3  ;;  %vm148_vm5 = vcmp.lt.s32.totalorder %v847_v4, 4  ;;  %v129_v34 = vshrl.u32 %v813_v6, %v128_v5 }
  0x36   :  { %v132_v26 = vor.u32 %v131_v18, %v130_v7  ;;  %v135_v27 = vor.u32 %v134_v19, %v133_v9  ;;  %v138_v28 = vor.u32 %v137_v20, %v136_v11  ;;  %v141_v29 = vor.u32 %v140_v21, %v139_v13 }
  0x37   :  { %v144_v30 = vor.u32 %v143_v23, %v142_v15  ;;  %v281_v53 = vand.u32 31, %v279_v40  ;;  %v895_v1 = vshrl.u32 %v279_v40, 5  ;;  %v819_v23 = vmov 0  }
  0x38   :  { %v153_v32 = vsel %vm145_vm1, %v132_v26, %v135_v27  ;;  %v154_v35 = vsel %vm148_vm5, %v141_v29, 920167782  ;;  %v157_v38 = vsel %vm145_vm1, %v135_v27, %v138_v28  ;;  %v150_v41 = vsel %vm148_vm5, %v138_v28, 2102212464 }
  0x39   :  { %v155_v37 = vsel %vm147_vm4, %v138_v28, %v154_v35  ;;  %v158_v39 = vsel %vm148_vm5, %v144_v30, 1326507024  ;;  %v149_v51 = vsel %vm145_vm1, %v129_v34, %v132_v26  ;;  %v151_v54 = vsel %vm147_vm4, %v135_v27, %v150_v41 }
  0x3a   :  { %v156_v42 = vsel %vm146_vm3, %v153_v32, %v155_v37  ;;  %v159_v48 = vsel %vm147_vm4, %v141_v29, %v158_v39  ;;  %v899_v3 = vsel %vm146_vm3, %v149_v51, %v151_v54  ;;  %v901_v9 = vsub.s32 32, %v281_v53 }
  0x3b   :  { %v186_v49 = vand.u32 65535, %v156_v42  ;;  %v187_v50 = vshrl.u32 %v156_v42, 16  ;;  %v160_v52 = vsel %vm146_vm3, %v157_v38, %v159_v48  ;;  %v284_v30 = vshll.u32 %v813_v6, %v281_v53 }
  0x3c   :  { %v164_v55 = vand.u32 65535, %v160_v52  ;;  %v165_v57 = vshrl.u32 %v160_v52, 16  ;;  %v287_v37 = vshll.u32 %v814_v8, %v281_v53  ;;  %v288_v40 = vshrl.u32 %v815_v10, %v901_v9 }
  0x3d   :  { %v189_v58 = vmul.u32 %v187_v50, %v162_v36  ;;  %v188_v59 = vmul.u32 %v186_v49, %v162_v36  ;;  %v190_v60 = vmul.u32 %v186_v49, %v163_v43  ;;  %v191_v5 = vmul.u32 %v187_v50, %v163_v43 }
  0x3e   :  { %v166_v62 = vmul.u32 %v164_v55, %v162_v36  ;;  %v167_v63 = vmul.u32 %v165_v57, %v162_v36  ;;  %v168_v0 = vmul.u32 %v164_v55, %v163_v43  ;;  %v169_v11 = vmul.u32 %v165_v57, %v163_v43 }
  0x3f   :  { %v192_v7 = vshll.u32 %v189_v58, 16  ;;  %v193_v16 = vshrl.u32 %v189_v58, 16  ;;  %v194_v20 = vshll.u32 %v190_v60, 16  ;;  %v195_v28 = vshrl.u32 %v190_v60, 16 }
  0x40   :  { %v170_v13 = vshll.u32 %v167_v63, 16  ;;  %v172_v15 = vshll.u32 %v168_v0, 16  ;;  %v171_v18 = vshrl.u32 %v167_v63, 16  ;;  %v173_v19 = vshrl.u32 %v168_v0, 16 }
  0x41   :  { %vm196_vm6 = vc.u32 %v188_v59, %v192_v7  ;;  %v198_v26 = vadd.s32 %v192_v7, %v188_v59  ;;  %v285_v36 = vshrl.u32 %v814_v8, %v901_v9  ;;  %v290_v41 = vshll.u32 %v815_v10, %v281_v53 }
  0x42   :  { %vm174_vm7 = vc.u32 %v166_v62, %v170_v13  ;;  %v176_v21 = vadd.s32 %v170_v13, %v166_v62  ;;  %v197_v4 = vsel %vm196_vm6, 1, %v819_v23  ;;  %v291_v43 = vshrl.u32 %v816_v12, %v901_v9 }
  0x43   :  { %v175_v27 = vsel %vm174_vm7, 1, %v819_v23  ;;  %v199_v29 = vadd.s32 %v197_v4, %v191_v5  ;;  %vm200_vm9 = vc.u32 %v198_v26, %v194_v20  ;;  %v908_v33 = vadd.s32 %v198_v26, %v194_v20 }
  0x44   :  { %v177_v32 = vadd.s32 %v175_v27, %v169_v11  ;;  %vm178_vm8 = vc.u32 %v176_v21, %v172_v15  ;;  %v201_v35 = vsel %vm200_vm9, 1, %v819_v23  ;;  %v918_v42 = vor.u32 %v285_v36, %v284_v30 }
  0x45   :  { %v179_v34 = vsel %vm178_vm8, 1, %v819_v23  ;;  %v203_v39 = vadd.s32 %v201_v35, %v199_v29  ;;  %v293_v44 = vshll.u32 %v816_v12, %v281_v53  ;;  %v294_v48 = vshrl.u32 %v817_v14, %v901_v9 }
  0x46   :  { %v181_v38 = vadd.s32 %v179_v34, %v177_v32  ;;  %v925_v8 = vor.u32 %v288_v40, %v287_v37  ;;  %v296_v51 = vshll.u32 %v817_v14, %v281_v53  ;;  %v928_v52 = vor.u32 %v291_v43, %v290_v41 }
  0x47   :  { %v204_v50 = vadd.s32 %v203_v39, %v193_v16  ;;  %v295_v54 = vor.u32 %v294_v48, %v293_v44  ;;  %v297_v10 = vshrl.u32 %v818_v22, %v901_v9  ;;  %vm299_vm10 = vcmp.lt.s32.totalorder %v895_v1, 1 }
  0x48   :  { %v182_v49 = vadd.s32 %v181_v38, %v171_v18  ;;  %v46_v12 = vxor.u32 %v884_v45, %v42_v25  ;;  %v938_v58 = vshll.u32 %v275_v61, 8  ;;  %v206_v14 = vmul.u32 %v860_v24, %v899_v3 }
  0x49   :  { %v205_v57 = vadd.s32 %v204_v50, %v195_v28  ;;  %v298_v53 = vor.u32 %v297_v10, %v296_v51  ;;  %vm301_vm11 = vcmp.lt.s32.totalorder %v895_v1, 3  ;;  %vm302_vm12 = vcmp.lt.s32.totalorder %v895_v1, 4 }
  0x4a   :  { %v936_v55 = vadd.s32 %v182_v49, %v173_v19  ;;  %vm300_vm14 = vcmp.lt.s32.totalorder %v895_v1, 2  ;;  %v307_v2 = vsel %vm299_vm10, %v918_v42, %v925_v8  ;;  %v308_v25 = vsel %vm302_vm12, %v295_v54, 920167782 }
  0x4b   :  { %v209_v22 = vadd.s32 1, %v205_v57  ;;  %v311_v24 = vsel %vm299_vm10, %v925_v8, %v928_v52  ;;  %v312_v45 = vsel %vm302_vm12, %v298_v53, 1326507024  ;;  %v68_v59 = vshrl.u32 %v46_v12, 8 }
  0x4c   :  { %vm208_vm13 = vc.u32 %v936_v55, %v908_v33  ;;  %v309_v61 = vsel %vm301_vm11, %v928_v52, %v308_v25  ;;  %v313_v62 = vsel %vm301_vm11, %v295_v54, %v312_v45  ;;  %v316_v5 = vand.u32 65535, %v938_v58 }
  0x4d   :  { %v210_v60 = vsel %vm208_vm13, %v209_v22, %v205_v57  ;;  %v310_v0 = vsel %vm300_vm14, %v307_v2, %v309_v61  ;;  %v314_v3 = vsel %vm300_vm14, %v311_v24, %v313_v62  ;;  %v317_v7 = vshrl.u32 %v938_v58, 16 }
  0x4e   :  { %v211_v63 = vadd.s32 %v210_v60, %v206_v14  ;;  %v318_v11 = vand.u32 65535, %v314_v3  ;;  %v319_v15 = vshrl.u32 %v314_v3, 16  ;;  %v340_v16 = vand.u32 65535, %v310_v0 }
  0x4f   :  { %v341_v18 = vshrl.u32 %v310_v0, 16  ;;  %v70_v19 = vcvt.s32.f32 %v68_v59  ;;  %v82_v20 = vmul.f32 0.6931472, %v903_v17  ;;  %v283_v51 = vshrl.u32 %v813_v6, %v901_v9 }
  0x50   :  { %v212_v13 = vadd.s32 536870912, %v211_v63  ;;  %v322_v21 = vmul.u32 %v318_v11, %v317_v7  ;;  %v320_v26 = vmul.u32 %v318_v11, %v316_v5  ;;  %v321_v27 = vmul.u32 %v319_v15, %v316_v5 }
  0x51   :  { %v342_v28 = vmul.u32 %v340_v16, %v316_v5  ;;  %v343_v29 = vmul.u32 %v341_v18, %v316_v5  ;;  %v344_v30 = vmul.u32 %v340_v16, %v317_v7  ;;  %v323_v34 = vmul.u32 %v319_v15, %v317_v7 }
  0x52   :  { %v971_v4 = vshrl.u32 %v212_v13, 30  ;;  %v324_v35 = vshll.u32 %v321_v27, 16  ;;  %v326_v36 = vshll.u32 %v322_v21, 16  ;;  %v72_v37 = vmul.f32 5.9604645e-08, %v70_v19 }
  0x53   :  { %v974_v38 = vmul.f32 -2.0, %v82_v20  ;;  %v346_v39 = vshll.u32 %v343_v29, 16  ;;  %v345_v41 = vmul.u32 %v341_v18, %v317_v7  ;;  %v325_v43 = vshrl.u32 %v321_v27, 16 }
  0x54   :  { %v214_v32 = vshll.u32 %v971_v4, 30  ;;  %vm328_vm15 = vc.u32 %v320_v26, %v324_v35  ;;  %v330_v17 = vadd.s32 %v324_v35, %v320_v26  ;;  %v348_v48 = vshll.u32 %v344_v30, 16 }
  0x55   :  { %v329_v44 = vsel %vm328_vm15, 1, %v819_v23  ;;  %vm350_vm0 = vc.u32 %v342_v28, %v346_v39  ;;  %v352_v12 = vadd.s32 %v346_v39, %v342_v28  ;;  %v304_v14 = vsel %vm302_vm12, %v928_v52, 2102212464 }
  0x56   :  { %v215_v40 = vsub.s32 %v211_v63, %v214_v32  ;;  %v331_v50 = vadd.s32 %v329_v44, %v323_v34  ;;  %vm332_vm2 = vc.u32 %v330_v17, %v326_v36  ;;  %v351_v10 = vsel %vm350_vm0, 1, %v819_v23 }
  0x57   :  { %v333_v54 = vsel %vm332_vm2, 1, %v819_v23  ;;  %v353_v22 = vadd.s32 %v351_v10, %v345_v41  ;;  %v327_v25 = vshrl.u32 %v322_v21, 16  ;;  %v347_v24 = vshrl.u32 %v343_v29, 16 }
  0x58   :  { %vm216_vm1 = vcmp.lt.s32.totalorder %v215_v40, 0  ;;  %v217_v49 = vsub.s32 0, %v215_v40  ;;  %v335_v53 = vadd.s32 %v333_v54, %v331_v50  ;;  %vm354_vm3 = vc.u32 %v352_v12, %v348_v48 }
  0x59   :  { %v355_v59 = vsel %vm354_vm3, 1, %v819_v23  ;;  %v303_v9 = vsel %vm299_vm10, %v283_v51, %v918_v42  ;;  %v305_v60 = vsel %vm301_vm11, %v925_v8, %v304_v14  ;;  %v80_v52 = vsub.f32 1.0, %v72_v37 }
  0x5a   :  { %v218_v57 = vsel %vm216_vm1, %v217_v49, %v215_v40  ;;  %v336_v45 = vadd.s32 %v335_v53, %v325_v43  ;;  %v357_v61 = vadd.s32 %v355_v59, %v353_v22  ;;  %781 = vrsqrt.f32 %v974_v38 }
  0x5b   :  { %v219_v2 = vclz %v218_v57  ;;  %v207_v62 = vadd.s32 %v908_v33, %v936_v55  ;;  %v349_v63 = vshrl.u32 %v344_v30, 16  ;;  %v356_v23 = vadd.s32 %v352_v12, %v348_v48 }
  0x5c   :  { %v337_v0 = vadd.s32 %v336_v45, %v327_v25  ;;  %v358_v3 = vadd.s32 %v357_v61, %v347_v24  ;;  %v306_v42 = vsel %vm300_vm14, %v303_v9, %v305_v60  ;;  %783 = vlog2.f32 %v80_v52 }
  0x5d   :  { %v758_v6 = vadd.s32 4294967294, %v219_v2  ;;  %v360_v18 = vmul.u32 %v938_v58, %v306_v42  ;;  %vm115_vm6 = vcmp.lt.s32.totalorder %v836_v46, 0  ;;  %vm1003_vm7 = vcmp.le.f32.partialorder %v113_v56, 0.7853982 }
  0x5e   :  { %v359_v8 = vadd.s32 %v358_v3, %v349_v63  ;;  %vm362_vm5 = vc.u32 %v337_v0, %v356_v23  ;;  %vm94_vm10 = vcmp.eq.f32.partialorder %v974_v38, inf  ;;  %vm96_vm11 = vcmp.eq.f32.partialorder %v974_v38, 0.0 }
  0x5f   :  { %vm759_vm4 = vcmp.lt.s32.totalorder %v758_v6, 0  ;;  %vm256_vm2 = vweird.f32 %v836_v46  ;;  %vm269_vm3 = vcmp.lt.s32.totalorder %v838_v47, 0 }
  0x60   :  { %v222_v5 = vsel %vm759_vm4, 0, %v758_v6  ;;  %v782_v33 = vpop.eup %781  ;;  %v363_v55 = vadd.s32 1, %v359_v8  ;;  %v361_v6 = vadd.s32 %v356_v23, %v337_v0  ;;  %vm268_vm4 = vcmp.le.f32.partialorder %v267_v31, 0.7853982 }
  0x61   :  { %v223_v7 = vsub.s32 32, %v222_v5  ;;  %v224_v11 = vshll.u32 %v215_v40, %v222_v5  ;;  %v227_v13 = vsub.s32 4294967266, %v222_v5  ;;  %v88_v26 = vmul.f32 %v782_v33, %v974_v38 }
  0x62   :  { %v364_v21 = vsel %vm362_vm5, %v363_v55, %v359_v8  ;;  %v784_v29 = vpop.eup %783  ;;  %v237_v40 = vsub.s32 4, %v971_v4  ;;  %v97_v8 = vand.u32 2147483648, %v974_v38 }
  0x63   :  { %v225_v15 = vshrl.u32 %v207_v62, %v223_v7  ;;  %v228_v16 = vadd.s32 127, %v227_v13  ;;  %v365_v28 = vadd.s32 %v364_v21, %v360_v18  ;;  %v89_v34 = vmul.f32 %v782_v33, %v88_v26 }
  0x64   :  { %v84_v37 = vmul.f32 0.6931472, %v784_v29  ;;  %v238_v50 = vsel %vm115_vm6, %v237_v40, %v971_v4 }
  0x65   :  { %v226_v19 = vor.u32 %v225_v15, %v224_v11  ;;  %v229_v20 = vshll.u32 %v228_v16, 23  ;;  %v366_v32 = vadd.s32 536870912, %v365_v28  ;;  %v90_v41 = vmul.f32 0.5, %v89_v34 }
  0x66   :  { %v1009_v48 = vmul.f32 -2.0, %v84_v37  ;;  %v240_v14 = vsel %vm1003_vm7, 0, %v238_v50 }
  0x67   :  { %v230_v27 = vor.u32 4788187, %v229_v20  ;;  %v233_v1 = vcvt.s32.f32 %v226_v19  ;;  %v998_v36 = vshrl.u32 %v366_v32, 30  ;;  %v91_v54 = vsub.f32 1.5, %v90_v41 }
  0x68   :  { %785 = vrsqrt.f32 %v1009_v48  ;;  %v569_v4 = vadd.s32 3, %v240_v14  ;;  %v257_v61 = vand.u32 3, %v240_v14  ;;  %vm106_vm5 = vcmp.eq.f32.partialorder %v1009_v48, inf }
  0x69   :  { %v231_v30 = vand.u32 2147483647, %v230_v27  ;;  %v368_v17 = vshll.u32 %v998_v36, 30  ;;  %v92_v24 = vmul.f32 %v782_v33, %v91_v54  ;;  %v391_v41 = vsub.s32 4, %v998_v36 }
  0x6a   :  { %v570_v42 = vand.u32 3, %v569_v4  ;;  %vm262_vm12 = vcmp.eq.s32.totalorder %v257_v61, 2  ;;  %vm258_vm14 = vcmp.lt.s32.totalorder %v257_v61, 2  ;;  %vm259_vm15 = vcmp.eq.s32.totalorder %v257_v61, 0 }
  0x6b   :  { %v234_v35 = vmul.f32 %v233_v1, %v231_v30  ;;  %v369_v44 = vsub.s32 %v365_v28, %v368_v17  ;;  %v93_v7 = vmul.f32 %v92_v24, %v974_v38 }
  0x6c   :  { %vm575_vm13 = vcmp.eq.s32.totalorder %v570_v42, 2  ;;  %vm572_vm0 = vcmp.eq.s32.totalorder %v570_v42, 0  ;;  %vm571_vm1 = vcmp.lt.s32.totalorder %v570_v42, 2 }
  0x6d   :  { %v235_v39 = vxor.u32 2147483648, %v234_v35  ;;  %vm370_vm8 = vcmp.lt.s32.totalorder %v369_v44, 0  ;;  %v371_v51 = vsub.s32 0, %v369_v44  ;;  %v95_v19 = vsel %vm94_vm10, %v974_v38, %v93_v7 }
  0x6e   :  { %v1018_v62 = vpop.eup %785  ;;  %v98_v32 = vsel %vm96_vm11, %v97_v8, %v95_v19 }
  0x6f   :  { %v236_v43 = vsel %vm115_vm6, %v235_v39, %v234_v35  ;;  %v372_v57 = vsel %vm370_vm8, %v371_v51, %v369_v44  ;;  %v100_v15 = vmul.f32 %v1018_v62, %v1009_v48  ;;  %vm108_vm8 = vcmp.eq.f32.partialorder %v1009_v48, 0.0 }
  0x70   :  { %v239_v49 = vsel %vm1003_vm7, %v836_v46, %v236_v43  ;;  %v373_v53 = vclz %v372_v57 }
  0x71   :  { %v241_v56 = vmul.f32 %v239_v49, %v239_v49  ;;  %v101_v37 = vmul.f32 %v1018_v62, %v100_v15 }
  0x72   :  { %v761_v25 = vadd.s32 4294967294, %v373_v53 }
  0x73   :  { %v242_v10 = vmul.f32 -0.001358992, %v241_v56  ;;  %v249_v12 = vmul.f32 -0.00019511016, %v241_v56  ;;  %v102_v50 = vmul.f32 0.5, %v101_v37 }
  0x74   :  { %vm762_vm9 = vcmp.lt.s32.totalorder %v761_v25, 0 }
  0x75   :  { %v243_v22 = vadd.f32 0.041655596, %v242_v10  ;;  %v250_v2 = vadd.f32 0.008332121, %v249_v12  ;;  %v376_v52 = vsel %vm762_vm9, 0, %v761_v25  ;;  %v103_v14 = vsub.f32 1.5, %v102_v50 }
  0x76   :  { %v377_v63 = vsub.s32 32, %v376_v52  ;;  %v378_v3 = vshll.u32 %v369_v44, %v376_v52  ;;  %v381_v5 = vsub.s32 4294967266, %v376_v52 }
  0x77   :  { %v244_v45 = vmul.f32 %v243_v22, %v241_v56  ;;  %v251_v59 = vmul.f32 %v250_v2, %v241_v56  ;;  %v104_v24 = vmul.f32 %v1018_v62, %v103_v14 }
  0x78   :  { %v379_v0 = vshrl.u32 %v361_v6, %v377_v63  ;;  %v382_v23 = vadd.s32 127, %v381_v5  ;;  %v109_v63 = vand.u32 2147483648, %v1009_v48 }
  0x79   :  { %v245_v9 = vadd.f32 -0.4999988, %v244_v45  ;;  %v252_v60 = vadd.f32 -0.16666654, %v251_v59 }
  0x7a   :  { %v380_v33 = vor.u32 %v379_v0, %v378_v3  ;;  %v383_v55 = vshll.u32 %v382_v23, 23 }
  0x7b   :  { %v246_v11 = vmul.f32 %v245_v9, %v241_v56  ;;  %v253_v13 = vmul.f32 %v252_v60, %v241_v56  ;;  %v392_v56 = vsel %vm269_vm3, %v391_v41, %v998_v36  ;;  %v105_v60 = vmul.f32 %v104_v24, %v1009_v48 }
  0x7c   :  { %v384_v26 = vor.u32 4788187, %v383_v55  ;;  %v387_v27 = vcvt.s32.f32 %v380_v33  ;;  %v394_v10 = vsel %vm268_vm4, 0, %v392_v56 }
  0x7d   :  { %v247_v16 = vadd.f32 1.0, %v246_v11  ;;  %v254_v18 = vadd.f32 1.0, %v253_v13  ;;  %v724_v2 = vadd.s32 3, %v394_v10  ;;  %v411_v4 = vand.u32 3, %v394_v10 }
  0x7e   :  { %v385_v30 = vand.u32 2147483647, %v384_v26  ;;  %v107_v5 = vsel %vm106_vm5, %v1009_v48, %v105_v60 }
  0x7f   :  { %v255_v20 = vmul.f32 %v254_v18, %v239_v49  ;;  %v263_v21 = vxor.u32 2147483648, %v247_v16  ;;  %v725_v6 = vand.u32 3, %v724_v2  ;;  %vm416_vm6 = vcmp.eq.s32.totalorder %v411_v4, 2 }
  0x80   :  { %v388_v39 = vmul.f32 %v387_v27, %v385_v30  ;;  %vm412_vm9 = vcmp.lt.s32.totalorder %v411_v4, 2  ;;  %vm413_vm10 = vcmp.eq.s32.totalorder %v411_v4, 0  ;;  %v110_v13 = vsel %vm108_vm8, %v109_v63, %v107_v5 }
  0x81   :  { %v260_v1 = vxor.u32 2147483648, %v255_v20  ;;  %v264_v28 = vsel %vm262_vm12, %v263_v21, %v255_v20  ;;  %v577_v29 = vsel %vm575_vm13, %v263_v21, %v255_v20  ;;  %vm730_vm7 = vcmp.eq.s32.totalorder %v725_v6, 2 }
  0x82   :  { %v389_v46 = vxor.u32 2147483648, %v388_v39  ;;  %vm727_vm11 = vcmp.eq.s32.totalorder %v725_v6, 0  ;;  %vm726_vm12 = vcmp.lt.s32.totalorder %v725_v6, 2  ;;  %vm410_vm13 = vweird.f32 %v838_v47 }
  0x83   :  { %v261_v34 = vsel %vm259_vm15, %v247_v16, %v260_v1  ;;  %v574_v35 = vsel %vm572_vm0, %v247_v16, %v260_v1 }
  0x84   :  { %v265_v58 = vsel %vm258_vm14, %v261_v34, %v264_v28  ;;  %v578_v40 = vsel %vm571_vm1, %v574_v35, %v577_v29  ;;  %v390_v49 = vsel %vm269_vm3, %v389_v46, %v388_v39 }
  0x85   :  { %v266_v17 = vsel %vm256_vm2, nan, %v265_v58  ;;  %v579_v43 = vsel %vm256_vm2, nan, %v578_v40  ;;  %v393_v51 = vsel %vm268_vm4, %v838_v47, %v390_v49 }
  0x86   :  { %v421_v38 = vmul.f32 %v266_v17, %v98_v32  ;;  %v735_v44 = vmul.f32 %v579_v43, %v98_v32  ;;  %v395_v54 = vmul.f32 %v393_v51, %v393_v51 }
  0x88   :  { %423 = vst [vmem:[#allocation4] sm:$0xff] %v421_v38  ;;  %v396_v12 = vmul.f32 -0.001358992, %v395_v54  ;;  %v403_v57 = vmul.f32 -0.00019511016, %v395_v54 }
  0x89   :  { %737 = vst [vmem:[#allocation4 + $0x8] sm:$0xff] %v735_v44 }
  0x8a   :  { %v397_v53 = vadd.f32 0.041655596, %v396_v12  ;;  %v404_v22 = vadd.f32 0.008332121, %v403_v57 }
  0x8c   :  { %v398_v31 = vmul.f32 %v397_v53, %v395_v54  ;;  %v405_v25 = vmul.f32 %v404_v22, %v395_v54 }
  0x8e   :  { %v399_v45 = vadd.f32 -0.4999988, %v398_v31  ;;  %v406_v59 = vadd.f32 -0.16666654, %v405_v25 }
  0x90   :  { %v400_v36 = vmul.f32 %v399_v45, %v395_v54  ;;  %v407_v9 = vmul.f32 %v406_v59, %v395_v54 }
  0x92   :  { %v401_v61 = vadd.f32 1.0, %v400_v36  ;;  %v408_v52 = vadd.f32 1.0, %v407_v9 }
  0x94   :  { %v409_v3 = vmul.f32 %v408_v52, %v393_v51  ;;  %v417_v62 = vxor.u32 2147483648, %v401_v61 }
  0x96   :  { %v414_v42 = vxor.u32 2147483648, %v409_v3  ;;  %v418_v7 = vsel %vm416_vm6, %v417_v62, %v409_v3  ;;  %v732_v11 = vsel %vm730_vm7, %v417_v62, %v409_v3 }
  0x98   :  { %v415_v0 = vsel %vm413_vm10, %v401_v61, %v414_v42  ;;  %v729_v23 = vsel %vm727_vm11, %v401_v61, %v414_v42 }
  0x99   :  { %v419_v8 = vsel %vm412_vm9, %v415_v0, %v418_v7  ;;  %v733_v48 = vsel %vm726_vm12, %v729_v23, %v732_v11 }
  0x9a   :  { %v420_v15 = vsel %vm410_vm13, nan, %v419_v8  ;;  %v734_v16 = vsel %vm410_vm13, nan, %v733_v48 }
  0x9b   :  { %v422_v18 = vmul.f32 %v420_v15, %v110_v13  ;;  %v736_v33 = vmul.f32 %v734_v16, %v110_v13 }
  0x9d   :  { %424 = vst [vmem:[#allocation4 + $0x10] sm:$0xff] %v422_v18 }
  0x9e   :  { %738 = vst [vmem:[#allocation4 + $0x18] sm:$0xff] %v736_v33 }
  0x9f   :  { %751 = dma.vmem_to_hbm [thread:$0]  %s744_s10, 512, %s746_s13, [#allocation5], %s821_s14, %s821_s14, %s822_s15  }
  0xa0   :  { %811 = dma.done.wait [#allocation5], 512  }
  0xa1   :  { %812 = vsyncadd [#allocation5], 4294966784 }
  0xa2   :  { %756 = vsyncpa [#allocation5], 1 }

</bundles_post_ra>
